<compile_context>
chip_gen: v5e
topology: v5e:2x2
jax: 0.10.0
libtpu: 0.0.40
codegen_flags: <defaults>
</compile_context>

<pallas_src>
import numpy as np
import jax
import jax.numpy as jnp
from jax.experimental import pallas as pl
from jax.experimental.pallas import tpu as pltpu


def _ffn_kernel(x_ref, w_ref, b_ref, o_ref, acc_ref):
    # K-reduction accumulator: seed with the bias on the first K step, accumulate
    # MXU partial products in f32, cast + store on the last K step.
    @pl.when(pl.program_id(2) == 0)
    def _():
        acc_ref[...] = jnp.broadcast_to(
            b_ref[...].astype(jnp.float32), acc_ref.shape)

    acc_ref[...] += jnp.dot(x_ref[...], w_ref[...],
                            preferred_element_type=jnp.float32)

    @pl.when(pl.program_id(2) == pl.num_programs(2) - 1)
    def _():
        o_ref[...] = acc_ref[...].astype(o_ref.dtype)


def _round_up(x, m):
    return (x + m - 1) // m * m


def _pick_tile(extent, preferred, align):
    """Return (tile, padded_extent).

    tile is a multiple of `align`, is <= preferred whenever the extent allows,
    and evenly divides padded_extent (>= extent).  Never returns a huge
    full-extent block on a large non-dividing dim.
    """
    preferred = max(align, (preferred // align) * align)
    if extent <= preferred:
        padded = _round_up(extent, align)      # single aligned block
        return padded, padded
    # Prefer an exact divisor (no padding) as long as it is not too small.
    for t in range(preferred, align - 1, -align):
        if t * 2 < preferred:
            break
        if extent % t == 0:
            return t, extent
    # Otherwise keep the preferred tile and let zero padding absorb the remainder.
    return preferred, _round_up(extent, preferred)


def _pad2(a, rows, cols):
    r, c = a.shape
    if (r, c) == (rows, cols):
        return a
    return jnp.pad(a, ((0, rows - r), (0, cols - c)))


def prepare_linear_weight(weight):
    """One-time layout conversion: PyTorch nn.Linear weight (hidden_dim, dim) ->
    (dim, hidden_dim) so output channels are dense on the lane axis.  Do this at
    model-load time, not inside the per-step forward path."""
    return jnp.asarray(weight).T


def feed_forward(x, w_kn, bias, *, tm=512, tn=512, tk=1024):
    """FeedForward forward pass: y = x @ W.T + b  (Dropout(p=0) is the identity).

    x:    (..., dim)            activations (any number of leading dims)
    w_kn: (dim, hidden_dim)     pre-transposed weight (see prepare_linear_weight)
    bias: (hidden_dim,)
    returns (..., hidden_dim)
    """
    *lead, K = x.shape
    Kw, N = w_kn.shape
    assert Kw == K, "weight/activation dim mismatch"
    M = int(np.prod(lead)) if lead else 1

    tm, M_pad = _pick_tile(M, tm, 8)
    tk, K_pad = _pick_tile(K, tk, 128)
    tn, N_pad = _pick_tile(N, tn, 128)

    x2 = _pad2(x.reshape(M, K), M_pad, K_pad)
    w2 = _pad2(w_kn, K_pad, N_pad)
    b2 = _pad2(bias.reshape(1, N), 1, N_pad)

    grid = (M_pad // tm, N_pad // tn, K_pad // tk)

    itemsize = jnp.dtype(x.dtype).itemsize
    tile_bytes = (2 * (tm * tk + tk * tn + tm * tn) * itemsize   # double-buffered tiles
                  + tm * tn * 4                                  # f32 accumulator
                  + 2 * tn * itemsize)                           # bias row
    # Enough headroom over the estimate; 32 MiB floor clears v5e's 16 MiB scoped
    # default, 48 MiB cap stays under v7x's 64 MiB physical per TensorCore.
    vmem_limit = int(min(48 * 1024 * 1024,
                         max(32 * 1024 * 1024, 1.25 * tile_bytes)))

    out = pl.pallas_call(
        _ffn_kernel,
        out_shape=jax.ShapeDtypeStruct((M_pad, N_pad), x.dtype),
        grid_spec=pltpu.PrefetchScalarGridSpec(
            num_scalar_prefetch=0,
            grid=grid,
            in_specs=[
                pl.BlockSpec((tm, tk), lambda i, j, k: (i, k)),   # activations
                pl.BlockSpec((tk, tn), lambda i, j, k: (k, j)),   # weight (K, N)
                pl.BlockSpec((1, tn), lambda i, j, k: (0, j)),    # bias row
            ],
            out_specs=pl.BlockSpec((tm, tn), lambda i, j, k: (i, j)),
            scratch_shapes=[pltpu.VMEM((tm, tn), jnp.float32)],
        ),
        compiler_params=pltpu.CompilerParams(
            dimension_semantics=("parallel", "parallel", "arbitrary"),
            vmem_limit_bytes=vmem_limit),
        cost_estimate=pl.CostEstimate(
            flops=2 * M * N * K,
            bytes_accessed=(M * K + K * N + M * N + N) * itemsize,
            transcendentals=0),
    )(x2, w2, b2)

    # TODO(synk): training-mode dropout (p > 0) would need pltpu.prng_seed /
    # pltpu.prng_random_bits masking + 1/(1-p) scaling of x before the matmul;
    # with the module's default dropout=0.0 (eval mode) Dropout is the identity.
    return out[:M, :N].reshape(*lead, N)


if __name__ == "__main__":
    # Small shapes consistent with the module: batch=2, seq=8, dim=32, hidden_dim=64.
    B, L, dim, hidden_dim = 2, 8, 32, 64
    key = jax.random.PRNGKey(0)
    kx, kw, kb = jax.random.split(key, 3)
    x = jax.random.normal(kx, (B, L, dim), jnp.float32)
    weight = jax.random.normal(kw, (hidden_dim, dim), jnp.float32) * 0.1  # PyTorch layout
    bias = jax.random.normal(kb, (hidden_dim,), jnp.float32) * 0.1

    w_kn = prepare_linear_weight(weight)  # one-time, outside the forward path
    out = jax.block_until_ready(feed_forward(x, w_kn, bias))

    ref = x @ weight.T + bias
    np.testing.assert_allclose(np.asarray(out), np.asarray(ref), rtol=1e-5, atol=1e-5)
    print("KERNEL_OK")
</pallas_src>

<mosaic_0001>
module attributes {stable_mosaic.version = 11 : i64} {
  func.func @_ffn_kernel(%arg0: i32, %arg1: i32, %arg2: i32, %arg3: memref<16x128xf32, #tpu.memory_space<vmem>>, %arg4: memref<128x128xf32, #tpu.memory_space<vmem>>, %arg5: memref<1x128xf32, #tpu.memory_space<vmem>>, %arg6: memref<16x128xf32, #tpu.memory_space<vmem>>, %arg7: memref<16x128xf32, #tpu.memory_space<vmem>>) attributes {dimension_semantics = [#tpu.dimension_semantics<parallel>, #tpu.dimension_semantics<parallel>, #tpu.dimension_semantics<arbitrary>], iteration_bounds = array<i64: 1, 1, 1>, scalar_prefetch = 0 : i64, scratch_operands = 1 : i64, tpu.core_type = #tpu.core_type<tc>, window_params = [{transform_indices = @transform_0, window_bounds = array<i64: 16, 128>}, {transform_indices = @transform_1, window_bounds = array<i64: 128, 128>}, {transform_indices = @transform_2, window_bounds = array<i64: 1, 128>}, {transform_indices = @transform_3, window_bounds = array<i64: 16, 128>}]} {
    %c0_i32 = arith.constant 0 : i32
    %0 = arith.cmpi eq, %arg2, %c0_i32 : i32
    %1 = arith.extui %0 : i1 to i32
    %c0_i32_0 = arith.constant 0 : i32
    %2 = arith.cmpi ne, %1, %c0_i32_0 : i32
    scf.if %2 {
      %c0_10 = arith.constant 0 : index
      %c0_11 = arith.constant 0 : index
      %12 = vector.load %arg5[%c0_10, %c0_11] : memref<1x128xf32, #tpu.memory_space<vmem>>, vector<1x128xf32>
      %13 = vector.shape_cast %12 : vector<1x128xf32> to vector<1x128xf32>
      %14 = vector.broadcast %13 : vector<1x128xf32> to vector<16x128xf32>
      %c0_12 = arith.constant 0 : index
      %c0_13 = arith.constant 0 : index
      %15 = vector.load %arg7[%c0_12, %c0_13] : memref<16x128xf32, #tpu.memory_space<vmem>>, vector<16x128xf32>
      tpu.vector_store %arg7[%c0_12, %c0_13], %14 {strides = array<i32>} : memref<16x128xf32, #tpu.memory_space<vmem>>, vector<16x128xf32>,
    } else {
    }
    %c0 = arith.constant 0 : index
    %c0_1 = arith.constant 0 : index
    %3 = vector.load %arg7[%c0, %c0_1] : memref<16x128xf32, #tpu.memory_space<vmem>>, vector<16x128xf32>
    %c0_2 = arith.constant 0 : index
    %c0_3 = arith.constant 0 : index
    %4 = vector.load %arg3[%c0_2, %c0_3] : memref<16x128xf32, #tpu.memory_space<vmem>>, vector<16x128xf32>
    %c0_4 = arith.constant 0 : index
    %c0_5 = arith.constant 0 : index
    %5 = vector.load %arg4[%c0_4, %c0_5] : memref<128x128xf32, #tpu.memory_space<vmem>>, vector<128x128xf32>
    %cst = arith.constant dense<0.000000e+00> : vector<16x128xf32>
    %6 = tpu.matmul %4, %5, %cst {dimension_numbers = #tpu.dot_dimension_numbers<[1], [0], [0], [1], [0, 0, 1, 1], [], []>} : vector<16x128xf32>, vector<128x128xf32>, vector<16x128xf32> -> vector<16x128xf32>
    %7 = arith.addf %3, %6 : vector<16x128xf32>
    %c0_6 = arith.constant 0 : index
    %c0_7 = arith.constant 0 : index
    %8 = vector.load %arg7[%c0_6, %c0_7] : memref<16x128xf32, #tpu.memory_space<vmem>>, vector<16x128xf32>
    tpu.vector_store %arg7[%c0_6, %c0_7], %7 {strides = array<i32>} : memref<16x128xf32, #tpu.memory_space<vmem>>, vector<16x128xf32>,
    %c0_i32_8 = arith.constant 0 : i32
    %9 = arith.cmpi eq, %arg2, %c0_i32_8 : i32
    %10 = arith.extui %9 : i1 to i32
    %c0_i32_9 = arith.constant 0 : i32
    %11 = arith.cmpi ne, %10, %c0_i32_9 : i32
    scf.if %11 {
      %c0_10 = arith.constant 0 : index
      %c0_11 = arith.constant 0 : index
      %12 = vector.load %arg7[%c0_10, %c0_11] : memref<16x128xf32, #tpu.memory_space<vmem>>, vector<16x128xf32>
      %c0_12 = arith.constant 0 : index
      %c0_13 = arith.constant 0 : index
      %13 = vector.load %arg6[%c0_12, %c0_13] : memref<16x128xf32, #tpu.memory_space<vmem>>, vector<16x128xf32>
      tpu.vector_store %arg6[%c0_12, %c0_13], %12 {strides = array<i32>} : memref<16x128xf32, #tpu.memory_space<vmem>>, vector<16x128xf32>,
    } else {
    }
    return
  }
  func.func @transform_0(%arg0: i32, %arg1: i32, %arg2: i32) -> (i32, i32) {
    %c0_i32 = arith.constant 0 : i32
    return %arg0, %arg2 : i32, i32
  }
  func.func @transform_1(%arg0: i32, %arg1: i32, %arg2: i32) -> (i32, i32) {
    %c0_i32 = arith.constant 0 : i32
    return %arg2, %arg1 : i32, i32
  }
  func.func @transform_2(%arg0: i32, %arg1: i32, %arg2: i32) -> (i32, i32) {
    %c0_i32 = arith.constant 0 : i32
    %c0_i32_0 = arith.constant 0 : i32
    return %c0_i32, %arg1 : i32, i32
  }
  func.func @transform_3(%arg0: i32, %arg1: i32, %arg2: i32) -> (i32, i32) {
    %c0_i32 = arith.constant 0 : i32
    return %arg0, %arg1 : i32, i32
  }
}

</mosaic_0001>

<bundles_post_ra>
// kernel: tpu_custom_call.1
= control target key start
LH: loop header
LB: loop body
LE: loop exit
PB: predicated region body
PF: predicated region fallthrough
CT: control target
= control target key end

     0   :  { %8 = vsyncpa [#allocation4], 0  ;;  %s277_s0 = inlined_call_operand.hbm [shape: f32[16,128], index: 0, kind: input, shape index: {}]   ;;  %s278_s1 = inlined_call_operand.hbm [shape: f32[128,128], index: 1, kind: input, shape index: {}]   ;;  %s279_s2 = inlined_call_operand.vmem [shape: f32[1,128], index: 2, kind: input, shape index: {}]   ;;  %s280_s3 = inlined_call_operand.hbm [shape: f32[16,128], index: 3, kind: output, shape index: {}]  }
   0x1   :  { %9 = vsyncpa [#allocation7], 0 }
   0x2   :  { %10 = vsyncpa [#allocation5], 0  ;;  %s15_s14 = sshll.u32 %s277_s0, 4  ;;  %s231_s15 = smov [#allocation3]   ;;  %s16_s14 = int_to_ptr.hbm [resolvable:$true] %s15_s14 }
   0x3   :  { %s17_s16 = sshll.u32 %s231_s15, 4  ;;  %s28_s19 = sshll.u32 %s278_s1, 4  ;;  %s18_s16 = int_to_ptr.vmem [resolvable:$true] %s17_s16  ;;  %s29_s19 = int_to_ptr.hbm [resolvable:$true] %s28_s19 }
   0x4   :  { %s232_s20 = smov 128   ;;  %s233_s21 = smov 8  }
   0x5   :  { %23 = dma.hbm_to_vmem [thread:$0]  %s16_s14, 256, %s18_s16, [#allocation4], %s232_s20, %s232_s20, %s233_s21  }
   0x6   :  { %s234_s22 = smov [#allocation6]  }
   0x7   :  { %s30_s23 = sshll.u32 %s234_s22, 4  ;;  %s31_s23 = int_to_ptr.vmem [resolvable:$true] %s30_s23 }
   0x8   :  { %36 = dma.hbm_to_vmem [thread:$0]  %s29_s19, 2048, %s31_s23, [#allocation7], %s232_s20, %s232_s20, %s233_s21  }
   0x9   :  { %225 = dma.done.wait [#allocation4], 256  }
   0xa   :  { %226 = vsyncadd [#allocation4], 4294967040 }
   0xb   :  { %227 = dma.done.wait [#allocation7], 2048  }
   0xc   :  { %228 = vsyncadd [#allocation7], 4294965248  ;;  %v76_v0 = vld [vmem:[#allocation6 + $0x78] sm:$0xff]  ;;  %v75_v1 = vld [vmem:[#allocation6 + $0x70] sm:$0xff]  ;;  %s235_s24 = smov [#allocation8]   ;;  %s117_s28 = sshll.u32 %s280_s3, 4  ;;  %s118_s28 = int_to_ptr.hbm [resolvable:$true] %s117_s28 }
   0xd   :  { %77 = vmatpush.msra.mxu0 %v76_v0  ;;  %131 = vmatpush.msra.mxu1 %v76_v0  ;;  %v74_v2 = vld [vmem:[#allocation6 + $0x68] sm:$0xff]  ;;  %v73_v3 = vld [vmem:[#allocation6 + $0x60] sm:$0xff]  ;;  %v72_v4 = vld [vmem:[#allocation6 + $0x58] sm:$0xff]  ;;  %s115_s25 = sshll.u32 %s235_s24, 4  ;;  %s116_s25 = int_to_ptr.vmem [resolvable:$true] %s115_s25 }
   0xe   :  { %v71_v5 = vld [vmem:[#allocation6 + $0x50] sm:$0xff]  ;;  %v70_v6 = vld [vmem:[#allocation6 + $0x48] sm:$0xff]  ;;  %v69_v7 = vld [vmem:[#allocation6 + $0x40] sm:$0xff] }
   0xf   :  { %78 = vmatpush.msra.mxu0 %v75_v1  ;;  %132 = vmatpush.msra.mxu1 %v75_v1  ;;  %v68_v8 = vld [vmem:[#allocation6 + $0x38] sm:$0xff]  ;;  %v67_v9 = vld [vmem:[#allocation6 + $0x30] sm:$0xff]  ;;  %v66_v10 = vld [vmem:[#allocation6 + $0x28] sm:$0xff] }
  0x10   :  { %v65_v11 = vld [vmem:[#allocation6 + $0x20] sm:$0xff]  ;;  %v64_v12 = vld [vmem:[#allocation6 + $0x18] sm:$0xff]  ;;  %v63_v13 = vld [vmem:[#allocation6 + $0x10] sm:$0xff] }
  0x11   :  { %79 = vmatpush.msra.mxu0 %v74_v2  ;;  %133 = vmatpush.msra.mxu1 %v74_v2  ;;  %v62_v14 = vld [vmem:[#allocation6 + $0x8] sm:$0xff]  ;;  %v61_v15 = vld [vmem:[#allocation6] sm:$0xff]  ;;  %v59_v16 = vld [vmem:[#allocation3] sm:$0xff] }
  0x12   :  { %v60_v17 = vld [vmem:[#allocation3 + $0x8] sm:$0xff]  ;;  %v152_v18 = vld [vmem:[%s279_s2] ss:$0 sm:$0xff] }
  0x13   :  { %80 = vmatpush.msra.mxu0 %v73_v3  ;;  %134 = vmatpush.msra.mxu1 %v73_v3 }
  0x15   :  { %81 = vmatpush.msra.mxu0 %v72_v4  ;;  %135 = vmatpush.msra.mxu1 %v72_v4 }
  0x17   :  { %82 = vmatpush.msra.mxu0 %v71_v5  ;;  %136 = vmatpush.msra.mxu1 %v71_v5 }
  0x19   :  { %83 = vmatpush.msra.mxu0 %v70_v6  ;;  %137 = vmatpush.msra.mxu1 %v70_v6 }
  0x1b   :  { %84 = vmatpush.msra.mxu0 %v69_v7  ;;  %138 = vmatpush.msra.mxu1 %v69_v7 }
  0x1d   :  { %85 = vmatpush.msra.mxu0 %v68_v8  ;;  %139 = vmatpush.msra.mxu1 %v68_v8 }
  0x1f   :  { %86 = vmatpush.msra.mxu0 %v67_v9  ;;  %140 = vmatpush.msra.mxu1 %v67_v9 }
  0x21   :  { %87 = vmatpush.msra.mxu0 %v66_v10  ;;  %141 = vmatpush.msra.mxu1 %v66_v10 }
  0x23   :  { %88 = vmatpush.msra.mxu0 %v65_v11  ;;  %142 = vmatpush.msra.mxu1 %v65_v11 }
  0x25   :  { %89 = vmatpush.msra.mxu0 %v64_v12  ;;  %143 = vmatpush.msra.mxu1 %v64_v12 }
  0x27   :  { %90 = vmatpush.msra.mxu0 %v63_v13  ;;  %144 = vmatpush.msra.mxu1 %v63_v13 }
  0x29   :  { %91 = vmatpush.msra.mxu0 %v62_v14  ;;  %145 = vmatpush.msra.mxu1 %v62_v14 }
  0x2b   :  { %92 = vmatpush.msra.mxu0 %v61_v15  ;;  %146 = vmatpush.msra.mxu1 %v61_v15 }
  0x2c   :  { %93 = vmatmul.f32.vlgmr.msra.gmra.mxu0 %v59_v16  ;;  %96 = vmatmul.f32.vlgmr.msra.gmra.mxu1 %v60_v17 }
  0xa9   :  { %v94_v19 = vpop.f32.mrf.mxu0  ;;  %v97_v20 = vpop.f32.mrf.mxu1 }
  0xaa   :  { %v100_v21 = vadd.f32 %v152_v18, %v94_v19  ;;  %v101_v22 = vadd.f32 %v152_v18, %v97_v20 }
  0xac   :  { %109 = vst [vmem:[#allocation8] sm:$0xff] %v100_v21 }
  0xad   :  { %110 = vst [vmem:[#allocation8 + $0x8] sm:$0xff] %v101_v22 }
  0xae   :  { %123 = dma.vmem_to_hbm [thread:$0]  %s116_s25, 256, %s118_s28, [#allocation5], %s232_s20, %s232_s20, %s233_s21  }
  0xaf   :  { %229 = dma.done.wait [#allocation5], 256  }
  0xb0   :  { %230 = vsyncadd [#allocation5], 4294967040 }
  0xb1   :  { %128 = vsyncpa [#allocation4], 1 }
  0xb2   :  { %129 = vsyncpa [#allocation7], 1 }
  0xb3   :  { %130 = vsyncpa [#allocation5], 1 }

</bundles_post_ra>
